<compile_context>
chip_gen: v6e
topology: v6e:2x2x1
jax: 0.10.0
libtpu: 0.0.40
codegen_flags: <defaults>
</compile_context>

<pallas_src>
import functools
import math

import jax
import jax.numpy as jnp
from jax.experimental import pallas as pl
from jax.experimental.pallas import tpu as pltpu

_INV_SQRT2 = 1.0 / math.sqrt(2.0)


def _gelu_exact(x):
    # PyTorch nn.GELU() default = exact erf-based GELU.
    return 0.5 * x * (1.0 + jax.lax.erf(x * _INV_SQRT2))


def _gelu_tanh(x):
    # Cheaper tanh approximation (EUP tanh) for the VPU-bound small-emb regime.
    return jax.nn.gelu(x, approximate=True)


def _mlp_kernel(x_ref, w1_ref, b1_ref, w2_ref, b2_ref, o_ref, acc_ref, *,
                approx_gelu):
    act = _gelu_tanh if approx_gelu else _gelu_exact
    j = pl.program_id(1)

    @pl.when(j == 0)
    def _init():
        # Seed the accumulator with b2 so the finalize epilogue is GELU + store.
        acc_ref[...] = jnp.broadcast_to(b2_ref[...], acc_ref.shape)

    # matmul1 slab: (tm, emb) @ (emb, th), f32 MXU accumulation.
    h = jnp.dot(x_ref[...], w1_ref[...], preferred_element_type=jnp.float32)
    # Bias + GELU in b1's dtype: f32 for the exact path, bf16 when the second
    # matmul consumes bf16 anyway (halves VPU work on v6e/v7x bf16 VALUs).
    h = act(h.astype(b1_ref.dtype) + b1_ref[...])
    # matmul2 slab: (tm, th) @ (th, emb), accumulated into the f32 scratch.
    acc_ref[...] += jnp.dot(h.astype(w2_ref.dtype), w2_ref[...],
                            preferred_element_type=jnp.float32)

    @pl.when(j == pl.num_programs(1) - 1)
    def _finalize():
        o_ref[...] = act(acc_ref[...]).astype(o_ref.dtype)


def _round_up(a, b):
    return ((a + b - 1) // b) * b


def _default_vmem_limit_bytes():
    # ~75% of physical VMEM: ~96 MiB on v5e/v6e, ~48 MiB per TC on v7x.
    try:
        info = pltpu.get_tpu_info()
        cap = getattr(info, "vmem_capacity_bytes", None)
        if cap:
            return int(cap * 0.75)
    except Exception:
        pass
    return 48 * 1024 * 1024  # conservative, v7x-safe fallback


def mlp_pallas(x, w1, b1, w2, b2, *, tile_m=None, tile_h=None,
               use_approx_gelu=False, hidden_act_dtype=None,
               vmem_limit_bytes=None):
    """Fused MLP: gelu(gelu(x @ w1 + b1) @ w2 + b2).

    x:  (batch, seq, emb)
    w1: (emb, 4*emb)   b1: (4*emb,)
    w2: (4*emb, emb)   b2: (emb,)
    Matmul accumulation is always f32; the hidden GELU runs in bf16 when the
    weights are bf16 (v6e/v7x recipe), f32 otherwise (exact nn.GELU semantics).
    """
    batch, seq, emb = x.shape
    hidden = w1.shape[1]
    m = batch * seq

    if vmem_limit_bytes is None:
        vmem_limit_bytes = _default_vmem_limit_bytes()
    budget = int(0.8 * vmem_limit_bytes)  # headroom for compiler temporaries

    # Hidden-slab activation dtype: bf16 when the second matmul eats bf16 anyway.
    if hidden_act_dtype is None:
        hidden_act_dtype = jnp.bfloat16 if w2.dtype == jnp.bfloat16 else jnp.float32

    # ---- row tiling --------------------------------------------------------
    sub = 8 if x.dtype.itemsize >= 4 else (16 if x.dtype.itemsize == 2 else 32)
    tm = tile_m if tile_m is not None else 512  # weight-stream roofline knee
    tm = max(sub, _round_up(min(tm, _round_up(m, sub)), sub))
    # Keep >= 2 row tiles when possible: the "parallel" M axis is what shards
    # across v7x's two TensorCores.
    if -(-m // tm) < 2 and m >= 2 * sub:
        tm = _round_up(-(-m // 2), sub)

    # ---- hidden-dim padding (exact: zero W1 cols / W2 rows contribute 0) ----
    hidden_p = _round_up(hidden, 128)
    if hidden_p != hidden:
        w1 = jnp.pad(w1, ((0, 0), (0, hidden_p - hidden)))
        b1 = jnp.pad(b1, ((0, hidden_p - hidden),))
        w2 = jnp.pad(w2, ((0, hidden_p - hidden), (0, 0)))

    w_item = w1.dtype.itemsize
    x_item = x.dtype.itemsize
    b1_item = jnp.dtype(hidden_act_dtype).itemsize

    def vmem_bytes(tm_, th_):
        # double-buffered pipeline inputs/outputs + f32 accumulator scratch
        return (2 * (emb * th_ + th_ * emb) * w_item      # W1 + W2 slabs
                + 2 * tm_ * emb * x_item                  # x tile
                + 2 * tm_ * emb * x_item                  # out tile
                + tm_ * emb * 4                           # acc scratch
                + 2 * (th_ * b1_item + emb * 4))          # biases

    # Shrink rows if even the smallest hidden slab would not fit (huge emb).
    while vmem_bytes(tm, min(hidden_p, 128)) > budget and tm > sub:
        tm = max(sub, (tm // 2 // sub) * sub)

    # ---- hidden tiling -----------------------------------------------------
    if tile_h is not None:
        th = min(_round_up(tile_h, 128), hidden_p)
        if hidden_p % th != 0:
            th = hidden_p
    elif vmem_bytes(tm, hidden_p) <= budget:
        # Weights fully VMEM-resident: j axis collapses, W1/W2 index maps are
        # constant -> DMA'd once and reused across every row tile.
        th = hidden_p
    else:
        th = 128
        c = (min(hidden_p, 1024) // 128) * 128
        while c >= 128:
            if hidden_p % c == 0 and vmem_bytes(tm, c) <= budget:
                th = c
                break
            c -= 128

    # ---- pallas_call -------------------------------------------------------
    x2d = x.reshape(m, emb)                                   # free reshape
    b1_2d = b1.reshape(1, hidden_p).astype(hidden_act_dtype)
    b2_2d = b2.reshape(1, emb).astype(jnp.float32)

    grid = (pl.cdiv(m, tm), hidden_p // th)
    kernel = functools.partial(_mlp_kernel, approx_gelu=use_approx_gelu)

    out2d = pl.pallas_call(
        kernel,
        out_shape=jax.ShapeDtypeStruct((m, emb), x.dtype),
        grid_spec=pltpu.PrefetchScalarGridSpec(
            num_scalar_prefetch=0,
            grid=grid,
            in_specs=[
                pl.BlockSpec((tm, emb), lambda i, j: (i, 0)),   # x row tile
                pl.BlockSpec((emb, th), lambda i, j: (0, j)),   # W1 slab
                pl.BlockSpec((1, th), lambda i, j: (0, j)),     # b1 slab
                pl.BlockSpec((th, emb), lambda i, j: (j, 0)),   # W2 slab
                pl.BlockSpec((1, emb), lambda i, j: (0, 0)),    # b2
            ],
            out_specs=pl.BlockSpec((tm, emb), lambda i, j: (i, 0)),
            scratch_shapes=[pltpu.VMEM((tm, emb), jnp.float32)],
        ),
        compiler_params=pltpu.CompilerParams(
            dimension_semantics=("parallel", "arbitrary"),
            vmem_limit_bytes=vmem_limit_bytes,
        ),
    )(x2d, w1, b1_2d, w2, b2_2d)

    return out2d.reshape(batch, seq, emb)


def init_mlp_params(key, emb_dim, dtype=jnp.float32):
    """nn.Linear-style init (uniform +-1/sqrt(fan_in)); weights stored as
    (in_features, out_features): y = x @ W + b."""
    hidden = 4 * emb_dim
    k1, k2, k3, k4 = jax.random.split(key, 4)
    bound1 = 1.0 / math.sqrt(emb_dim)
    bound2 = 1.0 / math.sqrt(hidden)
    w1 = jax.random.uniform(k1, (emb_dim, hidden), dtype, -bound1, bound1)
    b1 = jax.random.uniform(k2, (hidden,), dtype, -bound1, bound1)
    w2 = jax.random.uniform(k3, (hidden, emb_dim), dtype, -bound2, bound2)
    b2 = jax.random.uniform(k4, (emb_dim,), dtype, -bound2, bound2)
    return w1, b1, w2, b2


def mlp_reference(x, w1, b1, w2, b2):
    h = jax.nn.gelu(x @ w1 + b1, approximate=False)
    return jax.nn.gelu(h @ w2 + b2, approximate=False)


if __name__ == "__main__":
    # Small but lane-dense demo shape: emb % 128 == 0, hidden = 512.
    batch, seq, emb_dim = 2, 8, 128

    key = jax.random.PRNGKey(0)
    kx, kp = jax.random.split(key)
    x = jax.random.normal(kx, (batch, seq, emb_dim), jnp.float32)
    w1, b1, w2, b2 = init_mlp_params(kp, emb_dim)

    # Exact f32 path: must match the erf-GELU reference tightly.
    out = jax.block_until_ready(mlp_pallas(x, w1, b1, w2, b2))
    ref = mlp_reference(x, w1, b1, w2, b2)
    assert out.shape == (batch, seq, emb_dim)
    assert jnp.allclose(out, ref, atol=1e-5, rtol=1e-5), "f32 mismatch vs reference"

    # bf16-operand fast path (the v6e/v7x recipe): bf16 matmul operands, bf16
    # hidden GELU, tanh-approx GELU, f32 accumulation.  Compared against the
    # exact reference on bf16-rounded inputs with an explicit loose tolerance.
    xb = x.astype(jnp.bfloat16)
    w1b = w1.astype(jnp.bfloat16)
    w2b = w2.astype(jnp.bfloat16)
    out_bf16 = jax.block_until_ready(
        mlp_pallas(xb, w1b, b1, w2b, b2, use_approx_gelu=True))
    assert out_bf16.shape == (batch, seq, emb_dim)
    assert out_bf16.dtype == jnp.bfloat16
    ref_bf16 = mlp_reference(xb.astype(jnp.float32),
                             w1b.astype(jnp.float32), b1,
                             w2b.astype(jnp.float32), b2)
    assert jnp.allclose(out_bf16.astype(jnp.float32), ref_bf16,
                        atol=3e-2, rtol=3e-2), "bf16 mismatch vs reference"

    print("KERNEL_OK")
</pallas_src>

<mosaic_0001>
module attributes {stable_mosaic.version = 11 : i64} {
  func.func @_mlp_kernel(%arg0: i32, %arg1: i32, %arg2: memref<8x128xf32, #tpu.memory_space<vmem>>, %arg3: memref<128x512xf32, #tpu.memory_space<vmem>>, %arg4: memref<1x512xf32, #tpu.memory_space<vmem>>, %arg5: memref<512x128xf32, #tpu.memory_space<vmem>>, %arg6: memref<1x128xf32, #tpu.memory_space<vmem>>, %arg7: memref<8x128xf32, #tpu.memory_space<vmem>>, %arg8: memref<8x128xf32, #tpu.memory_space<vmem>>) attributes {dimension_semantics = [#tpu.dimension_semantics<parallel>, #tpu.dimension_semantics<arbitrary>], iteration_bounds = array<i64: 2, 1>, scalar_prefetch = 0 : i64, scratch_operands = 1 : i64, tpu.core_type = #tpu.core_type<tc>, window_params = [{transform_indices = @transform_0, window_bounds = array<i64: 8, 128>}, {transform_indices = @transform_1, window_bounds = array<i64: 128, 512>}, {transform_indices = @transform_2, window_bounds = array<i64: 1, 512>}, {transform_indices = @transform_3, window_bounds = array<i64: 512, 128>}, {pipeline_mode = #tpu.pipeline_mode<synchronous>, transform_indices = @transform_4, window_bounds = array<i64: 1, 128>}, {transform_indices = @transform_5, window_bounds = array<i64: 8, 128>}]} {
    %c0_i32 = arith.constant 0 : i32
    %0 = arith.cmpi eq, %arg1, %c0_i32 : i32
    %1 = arith.extui %0 : i1 to i32
    %c0_i32_0 = arith.constant 0 : i32
    %2 = arith.cmpi ne, %1, %c0_i32_0 : i32
    scf.if %2 {
      %c0_18 = arith.constant 0 : index
      %c0_19 = arith.constant 0 : index
      %25 = vector.load %arg6[%c0_18, %c0_19] : memref<1x128xf32, #tpu.memory_space<vmem>>, vector<1x128xf32>
      %26 = vector.shape_cast %25 : vector<1x128xf32> to vector<1x128xf32>
      %27 = vector.broadcast %26 : vector<1x128xf32> to vector<8x128xf32>
      %c0_20 = arith.constant 0 : index
      %c0_21 = arith.constant 0 : index
      %28 = vector.load %arg8[%c0_20, %c0_21] : memref<8x128xf32, #tpu.memory_space<vmem>>, vector<8x128xf32>
      tpu.vector_store %arg8[%c0_20, %c0_21], %27 {strides = array<i32>} : memref<8x128xf32, #tpu.memory_space<vmem>>, vector<8x128xf32>,
    } else {
    }
    %c0 = arith.constant 0 : index
    %c0_1 = arith.constant 0 : index
    %3 = vector.load %arg2[%c0, %c0_1] : memref<8x128xf32, #tpu.memory_space<vmem>>, vector<8x128xf32>
    %c0_2 = arith.constant 0 : index
    %c0_3 = arith.constant 0 : index
    %4 = vector.load %arg3[%c0_2, %c0_3] : memref<128x512xf32, #tpu.memory_space<vmem>>, vector<128x512xf32>
    %cst = arith.constant dense<0.000000e+00> : vector<8x512xf32>
    %5 = tpu.matmul %3, %4, %cst {dimension_numbers = #tpu.dot_dimension_numbers<[1], [0], [0], [1], [0, 0, 1, 1], [], []>} : vector<8x128xf32>, vector<128x512xf32>, vector<8x512xf32> -> vector<8x512xf32>
    %c0_4 = arith.constant 0 : index
    %c0_5 = arith.constant 0 : index
    %6 = vector.load %arg4[%c0_4, %c0_5] : memref<1x512xf32, #tpu.memory_space<vmem>>, vector<1x512xf32>
    %7 = vector.broadcast %6 : vector<1x512xf32> to vector<8x512xf32>
    %8 = arith.addf %5, %7 : vector<8x512xf32>
    %cst_6 = arith.constant 5.000000e-01 : f32
    %9 = vector.broadcast %cst_6 : f32 to vector<8x512xf32>
    %10 = arith.mulf %9, %8 : vector<8x512xf32>
    %cst_7 = arith.constant 0.707106769 : f32
    %11 = vector.broadcast %cst_7 : f32 to vector<8x512xf32>
    %12 = arith.mulf %8, %11 : vector<8x512xf32>
    %13 = math.erf %12 : vector<8x512xf32>
    %cst_8 = arith.constant 1.000000e+00 : f32
    %14 = vector.broadcast %cst_8 : f32 to vector<8x512xf32>
    %15 = arith.addf %14, %13 : vector<8x512xf32>
    %16 = arith.mulf %10, %15 : vector<8x512xf32>
    %c0_9 = arith.constant 0 : index
    %c0_10 = arith.constant 0 : index
    %17 = vector.load %arg8[%c0_9, %c0_10] : memref<8x128xf32, #tpu.memory_space<vmem>>, vector<8x128xf32>
    %c0_11 = arith.constant 0 : index
    %c0_12 = arith.constant 0 : index
    %18 = vector.load %arg5[%c0_11, %c0_12] : memref<512x128xf32, #tpu.memory_space<vmem>>, vector<512x128xf32>
    %cst_13 = arith.constant dense<0.000000e+00> : vector<8x128xf32>
    %19 = tpu.matmul %16, %18, %cst_13 {dimension_numbers = #tpu.dot_dimension_numbers<[1], [0], [0], [1], [0, 0, 1, 1], [], []>} : vector<8x512xf32>, vector<512x128xf32>, vector<8x128xf32> -> vector<8x128xf32>
    %20 = arith.addf %17, %19 : vector<8x128xf32>
    %c0_14 = arith.constant 0 : index
    %c0_15 = arith.constant 0 : index
    %21 = vector.load %arg8[%c0_14, %c0_15] : memref<8x128xf32, #tpu.memory_space<vmem>>, vector<8x128xf32>
    tpu.vector_store %arg8[%c0_14, %c0_15], %20 {strides = array<i32>} : memref<8x128xf32, #tpu.memory_space<vmem>>, vector<8x128xf32>,
    %c0_i32_16 = arith.constant 0 : i32
    %22 = arith.cmpi eq, %arg1, %c0_i32_16 : i32
    %23 = arith.extui %22 : i1 to i32
    %c0_i32_17 = arith.constant 0 : i32
    %24 = arith.cmpi ne, %23, %c0_i32_17 : i32
    scf.if %24 {
      %c0_18 = arith.constant 0 : index
      %c0_19 = arith.constant 0 : index
      %25 = vector.load %arg8[%c0_18, %c0_19] : memref<8x128xf32, #tpu.memory_space<vmem>>, vector<8x128xf32>
      %cst_20 = arith.constant 5.000000e-01 : f32
      %26 = vector.broadcast %cst_20 : f32 to vector<8x128xf32>
      %27 = arith.mulf %26, %25 : vector<8x128xf32>
      %cst_21 = arith.constant 0.707106769 : f32
      %28 = vector.broadcast %cst_21 : f32 to vector<8x128xf32>
      %29 = arith.mulf %25, %28 : vector<8x128xf32>
      %30 = math.erf %29 : vector<8x128xf32>
      %cst_22 = arith.constant 1.000000e+00 : f32
      %31 = vector.broadcast %cst_22 : f32 to vector<8x128xf32>
      %32 = arith.addf %31, %30 : vector<8x128xf32>
      %33 = arith.mulf %27, %32 : vector<8x128xf32>
      %c0_23 = arith.constant 0 : index
      %c0_24 = arith.constant 0 : index
      %34 = vector.load %arg7[%c0_23, %c0_24] : memref<8x128xf32, #tpu.memory_space<vmem>>, vector<8x128xf32>
      tpu.vector_store %arg7[%c0_23, %c0_24], %33 {strides = array<i32>} : memref<8x128xf32, #tpu.memory_space<vmem>>, vector<8x128xf32>,
    } else {
    }
    return
  }
  func.func @transform_0(%arg0: i32, %arg1: i32) -> (i32, i32) {
    %c0_i32 = arith.constant 0 : i32
    %c0_i32_0 = arith.constant 0 : i32
    return %arg0, %c0_i32 : i32, i32
  }
  func.func @transform_1(%arg0: i32, %arg1: i32) -> (i32, i32) {
    %c0_i32 = arith.constant 0 : i32
    %c0_i32_0 = arith.constant 0 : i32
    return %c0_i32, %arg1 : i32, i32
  }
  func.func @transform_2(%arg0: i32, %arg1: i32) -> (i32, i32) {
    %c0_i32 = arith.constant 0 : i32
    %c0_i32_0 = arith.constant 0 : i32
    return %c0_i32, %arg1 : i32, i32
  }
  func.func @transform_3(%arg0: i32, %arg1: i32) -> (i32, i32) {
    %c0_i32 = arith.constant 0 : i32
    %c0_i32_0 = arith.constant 0 : i32
    return %arg1, %c0_i32 : i32, i32
  }
  func.func @transform_4(%arg0: i32, %arg1: i32) -> (i32, i32) {
    %c0_i32 = arith.constant 0 : i32
    %c0_i32_0 = arith.constant 0 : i32
    %c0_i32_1 = arith.constant 0 : i32
    return %c0_i32, %c0_i32_0 : i32, i32
  }
  func.func @transform_5(%arg0: i32, %arg1: i32) -> (i32, i32) {
    %c0_i32 = arith.constant 0 : i32
    %c0_i32_0 = arith.constant 0 : i32
    return %arg0, %c0_i32 : i32, i32
  }
}

</mosaic_0001>

<bundles_post_ra>
// kernel: tpu_custom_call.1
= control target key start
LH: loop header
LB: loop body
LE: loop exit
PB: predicated region body
PF: predicated region fallthrough
CT: control target
= control target key end

     0   :  { %s1556_s0 = inlined_call_operand.hbm [shape: f32[16,128], index: 0, kind: input, shape index: {}]   ;;  %s1557_s1 = inlined_call_operand.hbm [shape: f32[128,512], index: 1, kind: input, shape index: {}]   ;;  %s1558_s2 = inlined_call_operand.hbm [shape: f32[1,512], index: 2, kind: input, shape index: {}]   ;;  %s1559_s3 = inlined_call_operand.hbm [shape: f32[512,128], index: 3, kind: input, shape index: {}]   ;;  %s1560_s4 = inlined_call_operand.vmem [shape: f32[1,128], index: 4, kind: input, shape index: {}]   ;;  %s1561_s5 = inlined_call_operand.hbm [shape: f32[16,128], index: 5, kind: output, shape index: {}]  }
   0x1   :  { %1566 = sst [smem:[#allocation16_spill]] %s1557_s1 }
   0x2   :  { %10 = vsyncpa [#allocation4], 0 }
   0x3   :  { %12 = vsyncpa [#allocation4 + $0x1], 0 }
   0x4   :  { %13 = vsyncpa [#allocation7], 0 }
   0x5   :  { %14 = vsyncpa [#allocation10], 0 }
   0x6   :  { %15 = vsyncpa [#allocation5], 0 }
   0x7   :  { %17 = vsyncpa [#allocation5 + $0x1], 0  ;;  %s1360_s18 = smov 0   ;;  %s1362_s19 = smov 0  }
   0x8   :  { %s1364_s20 = smov 0   ;;  %s1366_s21 = smov 0  }
   0x9   :  { %s1368_s22 = smov 0   ;;  %s1370_s23 = smov 0  }
   0xa LB: > { %s926_s24 = sadd.s32 4294967295, %s1318_s23   ;;  %s927_s25 = sadd.s32 4294967294, %s1318_s23   ;;  %s1318_s23 = sphi %s1370_s23, %s23_s23   ;;  %s1314_s22 = sphi %s1368_s22, %s1585_s22   ;;  %s1310_s21 = sphi %s1366_s21, %s1584_s21   ;;  %s1306_s20 = sphi %s1364_s20, %s1583_s20   ;;  %s1302_s19 = sphi %s1362_s19, %s1582_s19   ;;  %s1298_s18 = sphi %s1360_s18, %s1581_s18  }
   0xb   : > { %p55_p0 = scmp.ne.s32.totalorder %s1302_s19, %s1298_s18  ;;  %p1394_p1 = scmp.eq.s32.totalorder %s926_s24, 0 }
   0xc   : > { %p1398_p2 = scmp.eq.s32.totalorder %s926_s24, 1  ;;  %p184_p3 = scmp.eq.s32.totalorder %s927_s25, 1 }
   0xd   : > { %s1567_s26 = scalar_select %p1394_p1, 1, 0 }
   0xe   : > { %p1404_p4 = por %p1394_p1, %p55_p0  ;;  %p928_p5 = scmp.ge.s32.totalorder %s1318_s23, 1 }
   0xf   : > { %p1409_p6 = por %p184_p3, %p55_p0  ;;  %p191_p7 = scmp.lt.s32.totalorder %s1318_s23, 3 }
  0x10   : > { %s1569_s28 = scalar_select %p1404_p4, 1, 0 }
  0x11   : > { %s1570_s29 = scalar_select %p1409_p6, 1, 0 }
  0x12   : > { %p1414_p8 = pnand %p928_p5, %p191_p7  ;;  %s1320_s6 = smov [#allocation6]  }
  0x13   : > { %s206_s7 = sshll.u32 %s1320_s6, 4  ;;  %s1321_s9 = smov [#allocation8]   ;;  %s207_s7 = int_to_ptr.vmem [resolvable:$true] %s206_s7 }
  0x14   : > { %s1571_s30 = scalar_select %p1414_p8, 1, 0 }
  0x15   : > { %p1032_p9 = pneg %p1414_p8  ;;  %s223_s10 = sshll.u32 %s1321_s9, 4  ;;  %s224_s10 = int_to_ptr.vmem [resolvable:$true] %s223_s10 }
  0x16   : > { %s1322_s11 = smov [#allocation9]   ;;  %s1135_s13 = scalar_lea.vmem %s207_s7, 8192 }
  0x17   : > { %p1423_p11 = pnand %p1032_p9, %p1394_p1  ;;  %s236_s12 = sshll.u32 %s1322_s11, 4  ;;  %s237_s12 = int_to_ptr.vmem [resolvable:$true] %s236_s12 }
  0x18   : > { %p1136_p13 = scmp.ne.s32.totalorder %s207_s7, %s1135_s13  ;;  %p1143_p5 = scmp.lt.s32.totalorder %s207_s7, %s207_s7 }
  0x19   : > { %p1126_p12 = pneg %p1423_p11  ;;  %p1144_p7 = scmp.lt.s32.totalorder %s1135_s13, %s1135_s13 }
  0x1b   : > { %p1138_p0 = pnand %p1136_p13, %p1126_p12  ;;  %p1145_p9 = por %p1144_p7, %p1143_p5 }
  0x1d   : > { %p1139_p3 = pneg %p1138_p0 }
  0x1f   : > { %p1146_p10 = pnand %p1145_p9, %p1139_p3 }
  0x21   : > { %1149 = shalt.err (!%p1146_p10)
}
  0x22   : > { %s1323_s14 = smov 512   ;;  %s1324_s15 = smov 32  }
  0x23   : > { %s1573_s1 = sld [smem:[#allocation16_spill]]  ;;  %s1161_s24 = scalar_lea.vmem %s224_s10, 64 }
  0x24   : > { %p1162_p6 = scmp.ne.s32.totalorder %s224_s10, %s1161_s24  ;;  %p1169_p1 = scmp.lt.s32.totalorder %s224_s10, %s224_s10 }
  0x25   : > { %p1170_p4 = scmp.lt.s32.totalorder %s1161_s24, %s1161_s24 }
  0x26   : > { %p1164_p13 = pnand %p1162_p6, %p1126_p12 }
  0x27   : > { %p1171_p5 = por %p1170_p4, %p1169_p1 }
  0x28   : > { %p1165_p0 = pneg %p1164_p13 }
  0x29   : > { %1035 = dma.hbm_to_vmem [thread:$0]  (!%p1423_p11), %s1573_s1, 8192, %s207_s7, [#allocation7], %s1323_s14, %s1323_s14, %s1324_s15  }
  0x2a   : > { %p1172_p3 = pnand %p1171_p5, %p1165_p0 }
  0x2c   : > { %1175 = shalt.err (!%p1172_p3)
}
  0x2d   : > { %1038 = dma.hbm_to_vmem [thread:$0]  (!%p1423_p11), %s1558_s2, 64, %s224_s10, [#allocation7]  }
  0x2e   : > { %s1187_s7 = scalar_lea.vmem %s237_s12, 8192  ;;  %p1195_p9 = scmp.lt.s32.totalorder %s237_s12, %s237_s12 }
  0x2f   : > { %p1188_p10 = scmp.ne.s32.totalorder %s237_s12, %s1187_s7  ;;  %p1196_p13 = scmp.lt.s32.totalorder %s1187_s7, %s1187_s7 }
  0x31   : > { %p1190_p7 = pnand %p1188_p10, %p1126_p12  ;;  %p1197_p8 = por %p1196_p13, %p1195_p9 }
  0x33   : > { %p1191_p6 = pneg %p1190_p7 }
  0x35   : > { %p1198_p1 = pnand %p1197_p8, %p1191_p6 }
  0x37   : > { %1201 = shalt.err (!%p1198_p1)
}
  0x38   : > { %s1325_s9 = smov 128   ;;  %s1326_s10 = smov 8  }
  0x39   : > { %1041 = dma.hbm_to_vmem [thread:$0]  (!%p1423_p11), %s1559_s3, 8192, %s237_s12, [#allocation10], %s1325_s9, %s1325_s9, %s1326_s10  }
  0x3a   : > { %s42_s14 = sadd.s32 1, %s1306_s20  ;;  %s35_s15 = sadd.s32 1, %s1314_s22 }
  0x3b   : > { %p49_p4 = scmp.ne.s32.totalorder %s1306_s20, %s1302_s19  ;;  %p37_p8 = scmp.ge.s32.totalorder %s35_s15, 2 }
  0x3c   : > { %p50_p12 = scmp.eq.s32.totalorder %s1318_s23, 0  ;;  %p1053_p5 = scmp.lt.s32.totalorder %s1318_s23, 2 }
  0x3d   : > { %p1460_p0 = por %p1398_p2, %p49_p4  ;;  %s1587_s15 = smov (%p37_p8, %s35_s15), 0 }
  0x3e   : > { %p51_p3 = por %p50_p12, %p49_p4  ;;  %s253_s8 = sand.u32 1, %s1306_s20  }
  0x3f   : > { %s39_s17 = ssub.s32 %s1314_s22, %s1587_s15  ;;  %s933_s12 = sshll.u32 %s253_s8, 3 }
  0x40   : > { %p40_p10 = scmp.eq.s32.totalorder %s39_s17, 0  ;;  %s934_s24 = sshll.u32 %s1314_s22, 7 }
  0x41   : > { %s262_s27 = scalar_lea.hbm %s1556_s0, %s934_s24  ;;  %s257_s9 = scalar_lea.vmem [#allocation3], %s933_s12 }
  0x42   : > { %s1472_s25 = scalar_select %p40_p10, %s1306_s20, %s42_s14  }
  0x43   : > { %s264_s10 = sshll.u32 %s257_s9, 4  ;;  %p1479_p2 = pnand %p1053_p5, %p51_p3  ;;  %s265_s10 = int_to_ptr.vmem [resolvable:$true] %s264_s10 }
  0x44   : > { %s254_s13 = scalar_lea.sflag [#allocation4], %s253_s8  ;;  %s1215_s17 = scalar_lea.vmem %s265_s10, 128 }
  0x45   : > { %p1204_p11 = pneg %p1479_p2  ;;  %p1216_p7 = scmp.ne.s32.totalorder %s265_s10, %s1215_s17 }
  0x46   : > { %s1327_s14 = smov [#allocation3]  }
  0x47   : > { %p1218_p6 = pnand %p1216_p7, %p1204_p11  ;;  %s1220_s1 = sshll.u32 %s1327_s14, 4  ;;  %s1221_s1 = int_to_ptr.vmem [resolvable:$false] %s1220_s1 }
  0x48   : > { %s1222_s24 = scalar_lea.vmem %s1221_s1, 256  ;;  %p1223_p13 = scmp.lt.s32.totalorder %s265_s10, %s1221_s1 }
  0x49   : > { %p1219_p9 = pneg %p1218_p6  ;;  %p1224_p1 = scmp.lt.s32.totalorder %s1222_s24, %s1215_s17 }
  0x4b   : > { %p1225_p4 = por %p1224_p1, %p1223_p13 }
  0x4d   : > { %p1226_p8 = pnand %p1225_p4, %p1219_p9 }
  0x4f   : > { %1229 = shalt.err (!%p1226_p8)
}
  0x50   : > { %1045 = dma.hbm_to_vmem [thread:$0]  (!%p1479_p2), %s262_s27, 128, %s265_s10, %s254_s13  }
  0x51   : > { %p1576_p12 = scmp.ne.s32.totalorder %s1571_s30, 0 }
  0x52   : > { %s1490_s8 = sand.u32 (!%p1576_p12), 1, %s1302_s19   ;;  %p1577_p5 = scmp.ne.s32.totalorder (!%p1576_p12), %s1569_s28, 0 }
  0x53   : > { %273 = sbr.rel (%p1576_p12) target bundleno = 581 (0x245), region = 40  ;;  %s936_s12 = sshll.u32 (!%p1576_p12), %s1490_s8, 3 }
  0x54   : > { %s276_s6 = scalar_lea.sflag (!%p1576_p12), [#allocation4], %s1490_s8  ;;  %s1496_s1 = scalar_lea.vmem (!%p1576_p12), [#allocation3], %s936_s12 }
  0x58   : > { %1281 = dma.done.wait (%p1577_p5), %s276_s6, 128  }
  0x59   : > { %1283 = vsyncadd (%p1577_p5), %s276_s6, 4294967168  ;;  %p1578_p3 = scmp.ne.s32.totalorder %s1567_s26, 0 }
  0x5b   : > { %1285 = dma.done.wait (%p1578_p3), [#allocation7], 8256  }
  0x5c   : > { %1287 = vsyncadd (%p1578_p3), [#allocation7], 4294959040 }
  0x5d   : > { %1289 = dma.done.wait (%p1578_p3), [#allocation10], 8192  }
  0x5e   : > { %1291 = vsyncadd (%p1578_p3), [#allocation10], 4294959104  ;;  %v1328_v0 = vmov 0.0   ;;  %v395_v1 = vld [vmem:[#allocation6 + $0x1e8] sm:$0xff]  ;;  %v397_v2 = vld [vmem:[#allocation6 + $0x1f8] sm:$0xff]  ;;  %s943_s30 = sshll.u32 %s1310_s21, 7 }
  0x5f   : > { %484 = vmatprep.mubr.f32.mxu0 %v1328_v0  ;;  %555 = vmatprep.mubr.f32.mxu1 %v1328_v0  ;;  %v394_v3 = vld [vmem:[#allocation6 + $0x1e0] sm:$0xff]  ;;  %v396_v4 = vld [vmem:[#allocation6 + $0x1f0] sm:$0xff]  ;;  %v391_v5 = vld [vmem:[#allocation6 + $0x1c8] sm:$0xff]  ;;  %s317_s7 = scalar_lea.vmem [#allocation11], %s936_s12  ;;  %s811_s11 = scalar_lea.hbm %s1561_s5, %s943_s30 }
  0x60   : > { %420 = vmatprep.subr.mxu0 %v395_v1  ;;  %491 = vmatprep.subr.mxu1 %v397_v2  ;;  %v393_v6 = vld [vmem:[#allocation6 + $0x1d8] sm:$0xff]  ;;  %v390_v7 = vld [vmem:[#allocation6 + $0x1c0] sm:$0xff]  ;;  %v392_v8 = vld [vmem:[#allocation6 + $0x1d0] sm:$0xff]  ;;  %s813_s27 = sshll.u32 %s317_s7, 4  ;;  %s800_s13 = scalar_lea.sflag [#allocation5], %s1490_s8  ;;  %s814_s27 = int_to_ptr.vmem [resolvable:$true] %s813_s27 }
  0x61   : > { %421 = vmatpush1.msra.mxu0 %v394_v3  ;;  %492 = vmatpush1.msra.mxu1 %v396_v4  ;;  %v387_v9 = vld [vmem:[#allocation6 + $0x1a8] sm:$0xff]  ;;  %v389_v10 = vld [vmem:[#allocation6 + $0x1b8] sm:$0xff]  ;;  %v386_v11 = vld [vmem:[#allocation6 + $0x1a0] sm:$0xff]  ;;  %s1230_s17 = scalar_lea.vmem %s814_s27, 128  ;;  %s1329_s14 = smov [#allocation11]  }
  0x62   : > { %422 = vmatprep.subr.mxu0 %v391_v5  ;;  %493 = vmatprep.subr.mxu1 %v393_v6  ;;  %v388_v12 = vld [vmem:[#allocation6 + $0x1b0] sm:$0xff]  ;;  %v383_v13 = vld [vmem:[#allocation6 + $0x188] sm:$0xff]  ;;  %v385_v14 = vld [vmem:[#allocation6 + $0x198] sm:$0xff]  ;;  %p1231_p10 = scmp.ne.s32.totalorder %s814_s27, %s1230_s17  ;;  %s1234_s21 = sshll.u32 %s1329_s14, 4  ;;  %s1235_s21 = int_to_ptr.vmem [resolvable:$false] %s1234_s21 }
  0x63   : > { %423 = vmatpush1.msra.mxu0 %v390_v7  ;;  %494 = vmatpush1.msra.mxu1 %v392_v8  ;;  %v382_v15 = vld [vmem:[#allocation6 + $0x180] sm:$0xff]  ;;  %v384_v16 = vld [vmem:[#allocation6 + $0x190] sm:$0xff]  ;;  %v379_v17 = vld [vmem:[#allocation6 + $0x168] sm:$0xff]  ;;  %s1236_s24 = scalar_lea.vmem %s1235_s21, 256  ;;  %p1237_p7 = scmp.lt.s32.totalorder %s814_s27, %s1235_s21 }
  0x64   : > { %424 = vmatprep.subr.mxu0 %v387_v9  ;;  %495 = vmatprep.subr.mxu1 %v389_v10  ;;  %v381_v18 = vld [vmem:[#allocation6 + $0x178] sm:$0xff]  ;;  %v378_v19 = vld [vmem:[#allocation6 + $0x160] sm:$0xff]  ;;  %v380_v20 = vld [vmem:[#allocation6 + $0x170] sm:$0xff]  ;;  %p1232_p2 = pnand %p1231_p10, %p1460_p0  ;;  %p1238_p6 = scmp.lt.s32.totalorder %s1236_s24, %s1230_s17 }
  0x65   : > { %425 = vmatpush1.msra.mxu0 %v386_v11  ;;  %496 = vmatpush1.msra.mxu1 %v388_v12  ;;  %v375_v21 = vld [vmem:[#allocation6 + $0x148] sm:$0xff]  ;;  %v377_v22 = vld [vmem:[#allocation6 + $0x158] sm:$0xff]  ;;  %v374_v23 = vld [vmem:[#allocation6 + $0x140] sm:$0xff] }
  0x66   : > { %426 = vmatprep.subr.mxu0 %v383_v13  ;;  %497 = vmatprep.subr.mxu1 %v385_v14  ;;  %v376_v24 = vld [vmem:[#allocation6 + $0x150] sm:$0xff]  ;;  %v371_v25 = vld [vmem:[#allocation6 + $0x128] sm:$0xff]  ;;  %v373_v26 = vld [vmem:[#allocation6 + $0x138] sm:$0xff]  ;;  %p1233_p11 = pneg %p1232_p2  ;;  %p1239_p9 = por %p1238_p6, %p1237_p7 }
  0x67   : > { %427 = vmatpush1.msra.mxu0 %v382_v15  ;;  %498 = vmatpush1.msra.mxu1 %v384_v16  ;;  %v370_v27 = vld [vmem:[#allocation6 + $0x120] sm:$0xff]  ;;  %v372_v28 = vld [vmem:[#allocation6 + $0x130] sm:$0xff]  ;;  %v367_v29 = vld [vmem:[#allocation6 + $0x108] sm:$0xff] }
  0x68   : > { %428 = vmatprep.subr.mxu0 %v379_v17  ;;  %499 = vmatprep.subr.mxu1 %v381_v18  ;;  %v369_v30 = vld [vmem:[#allocation6 + $0x118] sm:$0xff]  ;;  %v366_v31 = vld [vmem:[#allocation6 + $0x100] sm:$0xff]  ;;  %v368_v32 = vld [vmem:[#allocation6 + $0x110] sm:$0xff]  ;;  %p1240_p13 = pnand %p1239_p9, %p1233_p11 }
  0x69   : > { %429 = vmatpush1.msra.mxu0 %v378_v19  ;;  %500 = vmatpush1.msra.mxu1 %v380_v20  ;;  %v363_v33 = vld [vmem:[#allocation6 + $0xe8] sm:$0xff]  ;;  %v365_v34 = vld [vmem:[#allocation6 + $0xf8] sm:$0xff]  ;;  %v362_v35 = vld [vmem:[#allocation6 + $0xe0] sm:$0xff] }
  0x6a   : > { %430 = vmatprep.subr.mxu0 %v375_v21  ;;  %501 = vmatprep.subr.mxu1 %v377_v22  ;;  %v364_v36 = vld [vmem:[#allocation6 + $0xf0] sm:$0xff]  ;;  %v359_v37 = vld [vmem:[#allocation6 + $0xc8] sm:$0xff]  ;;  %v361_v38 = vld [vmem:[#allocation6 + $0xd8] sm:$0xff] }
  0x6b   : > { %431 = vmatpush1.msra.mxu0 %v374_v23  ;;  %502 = vmatpush1.msra.mxu1 %v376_v24  ;;  %v358_v39 = vld [vmem:[#allocation6 + $0xc0] sm:$0xff]  ;;  %v360_v40 = vld [vmem:[#allocation6 + $0xd0] sm:$0xff]  ;;  %v355_v41 = vld [vmem:[#allocation6 + $0xa8] sm:$0xff] }
  0x6c   : > { %432 = vmatprep.subr.mxu0 %v371_v25  ;;  %503 = vmatprep.subr.mxu1 %v373_v26  ;;  %v357_v42 = vld [vmem:[#allocation6 + $0xb8] sm:$0xff]  ;;  %v354_v43 = vld [vmem:[#allocation6 + $0xa0] sm:$0xff]  ;;  %v356_v44 = vld [vmem:[#allocation6 + $0xb0] sm:$0xff] }
  0x6d   : > { %433 = vmatpush1.msra.mxu0 %v370_v27  ;;  %504 = vmatpush1.msra.mxu1 %v372_v28  ;;  %v351_v45 = vld [vmem:[#allocation6 + $0x88] sm:$0xff]  ;;  %v353_v46 = vld [vmem:[#allocation6 + $0x98] sm:$0xff]  ;;  %v350_v47 = vld [vmem:[#allocation6 + $0x80] sm:$0xff] }
  0x6e   : > { %434 = vmatprep.subr.mxu0 %v367_v29  ;;  %505 = vmatprep.subr.mxu1 %v369_v30  ;;  %v352_v48 = vld [vmem:[#allocation6 + $0x90] sm:$0xff]  ;;  %v347_v49 = vld [vmem:[#allocation6 + $0x68] sm:$0xff]  ;;  %v349_v50 = vld [vmem:[#allocation6 + $0x78] sm:$0xff] }
  0x6f   : > { %435 = vmatpush1.msra.mxu0 %v366_v31  ;;  %506 = vmatpush1.msra.mxu1 %v368_v32  ;;  %v346_v51 = vld [vmem:[#allocation6 + $0x60] sm:$0xff]  ;;  %v348_v52 = vld [vmem:[#allocation6 + $0x70] sm:$0xff]  ;;  %v343_v53 = vld [vmem:[#allocation6 + $0x48] sm:$0xff] }
  0x70   : > { %436 = vmatprep.subr.mxu0 %v363_v33  ;;  %507 = vmatprep.subr.mxu1 %v365_v34  ;;  %v345_v54 = vld [vmem:[#allocation6 + $0x58] sm:$0xff]  ;;  %v342_v55 = vld [vmem:[#allocation6 + $0x40] sm:$0xff]  ;;  %v344_v56 = vld [vmem:[#allocation6 + $0x50] sm:$0xff] }
  0x71   : > { %437 = vmatpush1.msra.mxu0 %v362_v35  ;;  %508 = vmatpush1.msra.mxu1 %v364_v36  ;;  %v339_v57 = vld [vmem:[#allocation6 + $0x28] sm:$0xff]  ;;  %v341_v58 = vld [vmem:[#allocation6 + $0x38] sm:$0xff]  ;;  %v338_v59 = vld [vmem:[#allocation6 + $0x20] sm:$0xff] }
  0x72   : > { %438 = vmatprep.subr.mxu0 %v359_v37  ;;  %509 = vmatprep.subr.mxu1 %v361_v38  ;;  %v340_v60 = vld [vmem:[#allocation6 + $0x30] sm:$0xff]  ;;  %v335_v61 = vld [vmem:[#allocation6 + $0x8] sm:$0xff]  ;;  %v337_v62 = vld [vmem:[#allocation6 + $0x18] sm:$0xff] }
  0x73   : > { %439 = vmatpush1.msra.mxu0 %v358_v39  ;;  %510 = vmatpush1.msra.mxu1 %v360_v40  ;;  %v334_v63 = vld [vmem:[#allocation6] sm:$0xff]  ;;  %v336_v0 = vld [vmem:[#allocation6 + $0x10] sm:$0xff] }
  0x74   : > { %440 = vmatprep.subr.mxu0 %v355_v41  ;;  %511 = vmatprep.subr.mxu1 %v357_v42  ;;  %v333_v1 = vld [vmem:[%s1496_s1] sm:$0xff]  ;;  %v611_v14 = vld [vmem:[#allocation9 + $0xe0] sm:$0xff] }
  0x75   : > { %441 = vmatpush1.msra.mxu0 %v354_v43  ;;  %512 = vmatpush1.msra.mxu1 %v356_v44  ;;  %v614_v2 = vld [vmem:[#allocation9 + $0xf8] sm:$0xff]  ;;  %v613_v6 = vld [vmem:[#allocation9 + $0xf0] sm:$0xff]  ;;  %v612_v10 = vld [vmem:[#allocation9 + $0xe8] sm:$0xff] }
  0x76   : > { %442 = vmatprep.subr.mxu0 %v351_v45  ;;  %513 = vmatprep.subr.mxu1 %v353_v46  ;;  %v646_v3 = vld [vmem:[#allocation9 + $0x1f8] sm:$0xff]  ;;  %v645_v7 = vld [vmem:[#allocation9 + $0x1f0] sm:$0xff]  ;;  %v644_v11 = vld [vmem:[#allocation9 + $0x1e8] sm:$0xff] }
  0x77   : > { %443 = vmatpush1.msra.mxu0 %v350_v47  ;;  %514 = vmatpush1.msra.mxu1 %v352_v48  ;;  %v598_v4 = vld [vmem:[#allocation9 + $0x78] sm:$0xff]  ;;  %v597_v8 = vld [vmem:[#allocation9 + $0x70] sm:$0xff]  ;;  %v596_v12 = vld [vmem:[#allocation9 + $0x68] sm:$0xff] }
  0x78   : > { %444 = vmatprep.subr.mxu0 %v347_v49  ;;  %515 = vmatprep.subr.mxu1 %v349_v50  ;;  %v630_v5 = vld [vmem:[#allocation9 + $0x178] sm:$0xff]  ;;  %v629_v9 = vld [vmem:[#allocation9 + $0x170] sm:$0xff]  ;;  %v628_v13 = vld [vmem:[#allocation9 + $0x168] sm:$0xff] }
  0x79   : > { %445 = vmatpush1.msra.mxu0 %v346_v51  ;;  %516 = vmatpush1.msra.mxu1 %v348_v52  ;;  %v643_v15 = vld [vmem:[#allocation9 + $0x1e0] sm:$0xff]  ;;  %v610_v18 = vld [vmem:[#allocation9 + $0xd8] sm:$0xff]  ;;  %v609_v22 = vld [vmem:[#allocation9 + $0xd0] sm:$0xff] }
  0x7a   : > { %446 = vmatprep.subr.mxu0 %v343_v53  ;;  %517 = vmatprep.subr.mxu1 %v345_v54  ;;  %v595_v16 = vld [vmem:[#allocation9 + $0x60] sm:$0xff]  ;;  %v642_v19 = vld [vmem:[#allocation9 + $0x1d8] sm:$0xff]  ;;  %v641_v23 = vld [vmem:[#allocation9 + $0x1d0] sm:$0xff] }
  0x7b   : > { %447 = vmatpush1.msra.mxu0 %v342_v55  ;;  %518 = vmatpush1.msra.mxu1 %v344_v56  ;;  %v627_v17 = vld [vmem:[#allocation9 + $0x160] sm:$0xff]  ;;  %v594_v20 = vld [vmem:[#allocation9 + $0x58] sm:$0xff]  ;;  %v593_v24 = vld [vmem:[#allocation9 + $0x50] sm:$0xff] }
  0x7c   : > { %448 = vmatprep.subr.mxu0 %v339_v57  ;;  %519 = vmatprep.subr.mxu1 %v341_v58  ;;  %v626_v21 = vld [vmem:[#allocation9 + $0x158] sm:$0xff]  ;;  %v625_v25 = vld [vmem:[#allocation9 + $0x150] sm:$0xff]  ;;  %v608_v26 = vld [vmem:[#allocation9 + $0xc8] sm:$0xff] }
  0x7d   : > { %449 = vmatpush1.msra.mxu0 %v338_v59  ;;  %520 = vmatpush1.msra.mxu1 %v340_v60  ;;  %v640_v27 = vld [vmem:[#allocation9 + $0x1c8] sm:$0xff]  ;;  %v607_v30 = vld [vmem:[#allocation9 + $0xc0] sm:$0xff]  ;;  %v606_v34 = vld [vmem:[#allocation9 + $0xb8] sm:$0xff] }
  0x7e   : > { %450 = vmatprep.subr.mxu0 %v335_v61  ;;  %521 = vmatprep.subr.mxu1 %v337_v62  ;;  %v592_v28 = vld [vmem:[#allocation9 + $0x48] sm:$0xff]  ;;  %v639_v31 = vld [vmem:[#allocation9 + $0x1c0] sm:$0xff]  ;;  %v638_v35 = vld [vmem:[#allocation9 + $0x1b8] sm:$0xff] }
  0x7f   : > { %451 = vmatpush1.msra.mxu0 %v334_v63  ;;  %522 = vmatpush1.msra.mxu1 %v336_v0  ;;  %v624_v29 = vld [vmem:[#allocation9 + $0x148] sm:$0xff]  ;;  %v591_v32 = vld [vmem:[#allocation9 + $0x40] sm:$0xff]  ;;  %v590_v36 = vld [vmem:[#allocation9 + $0x38] sm:$0xff] }
  0x80   : > { %485 = vmatmul.mubr.f32.vlgmr.msra.gmra.mxu0 %v333_v1  ;;  %556 = vmatmul.mubr.f32.vlgmr.msra.gmra.mxu1 %v333_v1  ;;  %v623_v33 = vld [vmem:[#allocation9 + $0x140] sm:$0xff]  ;;  %v622_v37 = vld [vmem:[#allocation9 + $0x138] sm:$0xff]  ;;  %v605_v38 = vld [vmem:[#allocation9 + $0xb0] sm:$0xff] }
  0x81   : > { %946 = vmatprep.subr.mxu0 %v614_v2  ;;  %981 = vmatprep.subr.mxu1 %v646_v3  ;;  %v637_v39 = vld [vmem:[#allocation9 + $0x1b0] sm:$0xff]  ;;  %v604_v42 = vld [vmem:[#allocation9 + $0xa8] sm:$0xff]  ;;  %v603_v46 = vld [vmem:[#allocation9 + $0xa0] sm:$0xff]  ;;  %v400_v2 = vlaneseq }
  0x82   : > { %947 = vmatpush3.msra.mxu0 %v598_v4  ;;  %982 = vmatpush3.msra.mxu1 %v630_v5  ;;  %v589_v40 = vld [vmem:[#allocation9 + $0x30] sm:$0xff]  ;;  %v636_v43 = vld [vmem:[#allocation9 + $0x1a8] sm:$0xff]  ;;  %v635_v47 = vld [vmem:[#allocation9 + $0x1a0] sm:$0xff] }
  0x83   : > { %948 = vmatprep.subr.mxu0 %v613_v6  ;;  %983 = vmatprep.subr.mxu1 %v645_v7  ;;  %v621_v41 = vld [vmem:[#allocation9 + $0x130] sm:$0xff]  ;;  %v588_v44 = vld [vmem:[#allocation9 + $0x28] sm:$0xff]  ;;  %v587_v48 = vld [vmem:[#allocation9 + $0x20] sm:$0xff]  ;;  %v401_v3 = vshrl.u32 %v400_v2, 7 }
  0x84   : > { %949 = vmatpush3.msra.mxu0 %v597_v8  ;;  %984 = vmatpush3.msra.mxu1 %v629_v9  ;;  %v620_v45 = vld [vmem:[#allocation9 + $0x128] sm:$0xff]  ;;  %v619_v49 = vld [vmem:[#allocation9 + $0x120] sm:$0xff]  ;;  %v602_v50 = vld [vmem:[#allocation9 + $0x98] sm:$0xff] }
  0x85   : > { %950 = vmatprep.subr.mxu0 %v612_v10  ;;  %985 = vmatprep.subr.mxu1 %v644_v11  ;;  %v634_v51 = vld [vmem:[#allocation9 + $0x198] sm:$0xff]  ;;  %v601_v54 = vld [vmem:[#allocation9 + $0x90] sm:$0xff]  ;;  %v600_v58 = vld [vmem:[#allocation9 + $0x88] sm:$0xff]  ;;  %v402_v4 = vsub.s32 0, %v401_v3  ;;  %v410_v5 = vsub.s32 2, %v401_v3  ;;  %v406_v7 = vsub.s32 1, %v401_v3 }
  0x86   : > { %951 = vmatpush3.msra.mxu0 %v596_v12  ;;  %986 = vmatpush3.msra.mxu1 %v628_v13  ;;  %v586_v52 = vld [vmem:[#allocation9 + $0x18] sm:$0xff]  ;;  %v633_v55 = vld [vmem:[#allocation9 + $0x190] sm:$0xff]  ;;  %v632_v59 = vld [vmem:[#allocation9 + $0x188] sm:$0xff]  ;;  %v414_v8 = vsub.s32 3, %v401_v3 }
  0x87   : > { %952 = vmatprep.subr.mxu0 %v611_v14  ;;  %987 = vmatprep.subr.mxu1 %v643_v15  ;;  %v618_v53 = vld [vmem:[#allocation9 + $0x118] sm:$0xff]  ;;  %v585_v56 = vld [vmem:[#allocation9 + $0x10] sm:$0xff]  ;;  %v584_v60 = vld [vmem:[#allocation9 + $0x8] sm:$0xff] }
  0x88   : > { %953 = vmatpush3.msra.mxu0 %v595_v16  ;;  %988 = vmatpush3.msra.mxu1 %v627_v17  ;;  %v617_v57 = vld [vmem:[#allocation9 + $0x110] sm:$0xff]  ;;  %v616_v61 = vld [vmem:[#allocation9 + $0x108] sm:$0xff]  ;;  %v599_v62 = vld [vmem:[#allocation9 + $0x80] sm:$0xff] }
  0x89   : > { %954 = vmatprep.subr.mxu0 %v610_v18  ;;  %989 = vmatprep.subr.mxu1 %v642_v19  ;;  %v631_v63 = vld [vmem:[#allocation9 + $0x180] sm:$0xff]  ;;  %v398_v6 = vld [vmem:[#allocation8] sm:$0xf] }
  0x8a   : > { %955 = vmatpush3.msra.mxu0 %v594_v20  ;;  %990 = vmatpush3.msra.mxu1 %v626_v21  ;;  %v583_v0 = vld [vmem:[#allocation9] sm:$0xff]  ;;  %v403_v9 = vrot.slane %v398_v6, %v402_v4  ;;  %v411_v10 = vrot.slane %v398_v6, %v410_v5  ;;  %v407_v13 = vrot.slane %v398_v6, %v406_v7 }
  0x8b   : > { %956 = vmatprep.subr.mxu0 %v609_v22  ;;  %991 = vmatprep.subr.mxu1 %v641_v23  ;;  %v615_v1 = vld [vmem:[#allocation9 + $0x100] sm:$0xff]  ;;  %v415_v14 = vrot.slane %v398_v6, %v414_v8 }
  0x8c   : > { %957 = vmatpush3.msra.mxu0 %v593_v24  ;;  %992 = vmatpush3.msra.mxu1 %v625_v25 }
  0x8d   : > { %958 = vmatprep.subr.mxu0 %v608_v26  ;;  %993 = vmatprep.subr.mxu1 %v640_v27 }
  0x8e   : > { %959 = vmatpush3.msra.mxu0 %v592_v28  ;;  %994 = vmatpush3.msra.mxu1 %v624_v29 }
  0x8f   : > { %960 = vmatprep.subr.mxu0 %v607_v30  ;;  %995 = vmatprep.subr.mxu1 %v639_v31 }
  0x90   : > { %961 = vmatpush3.msra.mxu0 %v591_v32  ;;  %996 = vmatpush3.msra.mxu1 %v623_v33 }
  0x91   : > { %962 = vmatprep.subr.mxu0 %v606_v34  ;;  %997 = vmatprep.subr.mxu1 %v638_v35 }
  0x92   : > { %963 = vmatpush3.msra.mxu0 %v590_v36  ;;  %998 = vmatpush3.msra.mxu1 %v622_v37 }
  0x93   : > { %964 = vmatprep.subr.mxu0 %v605_v38  ;;  %999 = vmatprep.subr.mxu1 %v637_v39 }
  0x94   : > { %965 = vmatpush3.msra.mxu0 %v589_v40  ;;  %1000 = vmatpush3.msra.mxu1 %v621_v41 }
  0x95   : > { %966 = vmatprep.subr.mxu0 %v604_v42  ;;  %1001 = vmatprep.subr.mxu1 %v636_v43 }
  0x96   : > { %967 = vmatpush3.msra.mxu0 %v588_v44  ;;  %1002 = vmatpush3.msra.mxu1 %v620_v45 }
  0x97   : > { %968 = vmatprep.subr.mxu0 %v603_v46  ;;  %1003 = vmatprep.subr.mxu1 %v635_v47  ;;  %v941_v47 = vld [vmem:[%s1560_s4] ss:$0 sm:$0xff] }
  0x98   : > { %969 = vmatpush3.msra.mxu0 %v587_v48  ;;  %1004 = vmatpush3.msra.mxu1 %v619_v49 }
  0x99   : > { %970 = vmatprep.subr.mxu0 %v602_v50  ;;  %1005 = vmatprep.subr.mxu1 %v634_v51 }
  0x9a   : > { %971 = vmatpush3.msra.mxu0 %v586_v52  ;;  %1006 = vmatpush3.msra.mxu1 %v618_v53 }
  0x9b   : > { %972 = vmatprep.subr.mxu0 %v601_v54  ;;  %1007 = vmatprep.subr.mxu1 %v633_v55 }
  0x9c   : > { %973 = vmatpush3.msra.mxu0 %v585_v56  ;;  %1008 = vmatpush3.msra.mxu1 %v617_v57 }
  0x9d   : > { %974 = vmatprep.subr.mxu0 %v600_v58  ;;  %1009 = vmatprep.subr.mxu1 %v632_v59 }
  0x9e   : > { %975 = vmatpush3.msra.mxu0 %v584_v60  ;;  %1010 = vmatpush3.msra.mxu1 %v616_v61 }
  0x9f   : > { %976 = vmatprep.subr.mxu0 %v599_v62  ;;  %1011 = vmatprep.subr.mxu1 %v631_v63 }
  0xa0   : > { %977 = vmatpush3.msra.mxu0 %v583_v0  ;;  %1012 = vmatpush3.msra.mxu1 %v615_v1 }
 0x140   : > { %v486_v11 = vpop.f32.mrf.mxu0  ;;  %v557_v12 = vpop.f32.mrf.mxu1 }
 0x141   : > { %v487_v15 = vadd.f32 %v486_v11, %v403_v9  ;;  %v558_v16 = vadd.f32 %v557_v12, %v411_v10 }
 0x142   : > { %v488_v17 = vpop.f32.mrf.mxu0  ;;  %v559_v18 = vpop.f32.mrf.mxu1 }
 0x143   : > { %v566_v19 = vmul.f32 0.70710677, %v487_v15  ;;  %v568_v20 = vmul.f32 0.70710677, %v558_v16  ;;  %v489_v21 = vadd.f32 %v488_v17, %v407_v13  ;;  %v560_v22 = vadd.f32 %v559_v18, %v415_v14 }
 0x144   : > { %v562_v33 = vmul.f32 0.5, %v487_v15  ;;  %v564_v36 = vmul.f32 0.5, %v558_v16 }
 0x145   : > { %1114 = verf.f32 %v566_v19  ;;  %v567_v23 = vmul.f32 0.70710677, %v489_v21  ;;  %v569_v24 = vmul.f32 0.70710677, %v560_v22  ;;  %v563_v31 = vmul.f32 0.5, %v489_v21 }
 0x146   : > { %1116 = verf.f32 %v568_v20  ;;  %v565_v34 = vmul.f32 0.5, %v560_v22 }
 0x147   : > { %1118 = verf.f32 %v567_v23 }
 0x148   : > { %1120 = verf.f32 %v569_v24 }
 0x152   : > { %v1115_v25 = vpop.eup %1114 }
 0x153   : > { %v1117_v26 = vpop.eup %1116  ;;  %v574_v28 = vadd.f32 1.0, %v1115_v25 }
 0x154   : > { %v1119_v27 = vpop.eup %1118  ;;  %v576_v30 = vadd.f32 1.0, %v1117_v26 }
 0x155   : > { %v1121_v29 = vpop.eup %1120  ;;  %v575_v32 = vadd.f32 1.0, %v1119_v27  ;;  %v578_v38 = vmul.f32 %v574_v28, %v562_v33 }
 0x156   : > { %v577_v35 = vadd.f32 1.0, %v1121_v29  ;;  %v580_v40 = vmul.f32 %v576_v30, %v564_v36 }
 0x157   : > { %v579_v37 = vmul.f32 %v575_v32, %v563_v31 }
 0x158   : > { %v581_v39 = vmul.f32 %v577_v35, %v565_v34 }
 0x159   : > { %711 = vmatprep.mubr.f32.mxu0 %v579_v37 }
 0x15a   : > { %781 = vmatprep.mubr.f32.mxu1 %v581_v39  ;;  %712 = vmatmul.mubr.f32.vlgmr.msra.gmra.mxu0 %v578_v38 }
 0x15b   : > { %782 = vmatmul.mubr.f32.vlgmr.msra.gmra.mxu1 %v580_v40 }
 0x21a   : > { %v978_v41 = vpop.f32.mrf.mxu0 }
 0x21b   : > { %v1013_v42 = vpop.f32.mrf.mxu1 }
 0x21c   : > { %v979_v43 = vpop.f32.mrf.mxu0 }
 0x21d   : > { %v980_v44 = vadd.f32 %v979_v43, %v978_v41  ;;  %v1014_v45 = vpop.f32.mrf.mxu1 }
 0x21e   : > { %v1015_v46 = vadd.f32 %v1014_v45, %v1013_v42 }
 0x220   : > { %v784_v48 = vadd.f32 %v1015_v46, %v980_v44 }
 0x222   : > { %v787_v49 = vadd.f32 %v941_v47, %v784_v48 }
 0x224   : > { %v794_v50 = vmul.f32 0.70710677, %v787_v49  ;;  %v793_v52 = vmul.f32 0.5, %v787_v49 }
 0x226   : > { %1122 = verf.f32 %v794_v50 }
 0x233   : > { %v1123_v51 = vpop.eup %1122 }
 0x234   : > { %v796_v53 = vadd.f32 1.0, %v1123_v51 }
 0x236   : > { %v797_v54 = vmul.f32 %v796_v53, %v793_v52 }
 0x238   : > { %798 = vst [vmem:[%s317_s7] sm:$0xff] %v797_v54 }
 0x239   : > { %1243 = shalt.err (!%p1240_p13)
}
 0x23a   : > { %s1244_s12 = scalar_lea.hbm %s811_s11, 128  ;;  %s1248_s1 = scalar_lea.hbm %s1561_s5, 256 }
 0x23b   : > { %p1245_p1 = scmp.ne.s32.totalorder %s811_s11, %s1244_s12  ;;  %p1249_p12 = scmp.lt.s32.totalorder %s811_s11, %s1561_s5 }
 0x23c   : > { %p1250_p5 = scmp.lt.s32.totalorder %s1248_s1, %s1244_s12 }
 0x23d   : > { %p1246_p4 = pnand %p1245_p1, %p1460_p0 }
 0x23e   : > { %p1251_p3 = por %p1250_p5, %p1249_p12 }
 0x23f   : > { %p1247_p8 = pneg %p1246_p4 }
 0x241   : > { %p1252_p10 = pnand %p1251_p3, %p1247_p8 }
 0x243   : > { %1255 = shalt.err (!%p1252_p10)
}
 0x244   : > { %1030 = dma.vmem_to_hbm [thread:$0]  (%p1460_p0), %s814_s27, 128, %s811_s11, %s800_s13  }
 0x245 PF: > { %s825_s30 = sand.u32 1, %s1298_s18   ;;  %p1579_p2 = scmp.ne.s32.totalorder %s1570_s29, 0 }
 0x246   : > { %p1580_p11 = scmp.ge.s32.totalorder %s1318_s23, 2  ;;  %s826_s7 = scalar_lea.sflag [#allocation5], %s825_s30 }
 0x248   : > { %p1047_p7 = pnand %p1580_p11, %p1579_p2 }
 0x24a   : > { %p1048_p6 = pneg %p1047_p7 }
 0x24c   : > { %1293 = dma.done.wait (%p1048_p6), %s826_s7, 128  }
 0x24d   : > { %1295 = vsyncadd (%p1048_p6), %s826_s7, 4294967168  ;;  %s23_s23 = sadd.s32 1, %s1318_s23   ;;  %s1581_s18 = smov %s1302_s19 }
 0x24e   : > { %p20_p9 = scmp.ge.s32.totalorder %s23_s23, 4   ;;  %s1582_s19 = smov %s1306_s20 }
 0x24f   : > { %s1583_s20 = smov %s1472_s25  ;;  %s1584_s21 = smov %s1314_s22 }
 0x250   : > { %s1585_s22 = smov %s1587_s15  ;;  %22 = sbr.rel (!%p20_p9) target bundleno = 10 (0xa), region = 108 }
 0x255   :  { %831 = vsyncpa [#allocation4], 1 }
 0x256   :  { %833 = vsyncpa [#allocation4 + $0x1], 1 }
 0x257   :  { %834 = vsyncpa [#allocation7], 1 }
 0x258   :  { %835 = vsyncpa [#allocation10], 1 }
 0x259   :  { %836 = vsyncpa [#allocation5], 1 }
 0x25a   :  { %838 = vsyncpa [#allocation5 + $0x1], 1 }

</bundles_post_ra>
